<compile_context>
chip_gen: v6e
topology: v6e:2x2x1
jax: 0.10.0
libtpu: 0.0.40
codegen_flags: <defaults>
</compile_context>

<pallas_src>
import jax
import jax.numpy as jnp
from jax.experimental import pallas as pl
from jax.experimental.pallas import tpu as pltpu

LANE = 128


def _hadamard_kernel(x1_ref, x2_ref, o_ref):
    # Elementwise Hadamard product on one (block_rows, lane_w) VMEM tile.
    o_ref[...] = x1_ref[...] * x2_ref[...]


def _choose_lane_width(n):
    """Largest lane-dense width (multiple of 128) that divides n."""
    for c in (2048, 1024, 512, 256, 128):
        if n % c == 0:
            return c
    return None


def efficient_memory_hadamard(
    x1,
    x2,
    *,
    min_pallas_bytes=1 << 20,      # below this, a fused XLA multiply wins
    target_tile_bytes=2 << 20,     # ~2 MiB per tile: fits all TPU generations
):
    """Forward of EfficientMemoryHadamard: result = x1 * x2 (+ kth placeholders)."""
    assert x1.shape == x2.shape, "Hadamard product requires equal shapes"
    out_dtype = jnp.promote_types(x1.dtype, x2.dtype)
    x1 = x1.astype(out_dtype)
    x2 = x2.astype(out_dtype)

    orig_shape = x1.shape
    n = x1.size
    itemsize = jnp.dtype(out_dtype).itemsize

    # kth_val_1 / kth_val_2 are 0.0 unless compress_type == 'PRUNE_ROW';
    # default module config ('JPEG') returns zeros and forwards only `result`.
    # TODO(synk): PRUNE_ROW kth-value (torch.kthvalue) path not implemented —
    # it only affects saved-for-backward tensors / running statistics.
    kth_val_1 = jnp.zeros((), dtype=jnp.float32)
    kth_val_2 = jnp.zeros((), dtype=jnp.float32)

    # Tiny inputs: kernel launch + pipeline setup is pure overhead.
    if n == 0 or n * itemsize < min_pallas_bytes:
        return x1 * x2, kth_val_1, kth_val_2

    x1f = x1.reshape(-1)
    x2f = x2.reshape(-1)

    if n % LANE == 0:
        # Copy-free reshape to a lane-dense 2D slab.
        lane_w = _choose_lane_width(n)
        n_pad = n
    else:
        # Rare ragged case: pad flat arrays (this is the only copying path).
        lane_w = 2048
        n_pad = ((n + lane_w - 1) // lane_w) * lane_w
        x1f = jnp.pad(x1f, (0, n_pad - n))
        x2f = jnp.pad(x2f, (0, n_pad - n))

    rows = n_pad // lane_w
    x1f = x1f.reshape(rows, lane_w)
    x2f = x2f.reshape(rows, lane_w)

    # dtype-aware sublane multiple: 8 (f32), 16 (bf16), 32 (int8).
    sublane_mult = max(8, 32 // itemsize)

    # Biggest block_rows that keeps one tile near target_tile_bytes.
    target_rows = max(1, target_tile_bytes // (lane_w * itemsize))
    block_rows = max(sublane_mult, (target_rows // sublane_mult) * sublane_mult)
    rows_ceil = ((rows + sublane_mult - 1) // sublane_mult) * sublane_mult
    block_rows = min(block_rows, rows_ceil)

    grid = (pl.cdiv(rows, block_rows),)

    out = pl.pallas_call(
        _hadamard_kernel,
        out_shape=jax.ShapeDtypeStruct((rows, lane_w), out_dtype),
        grid=grid,
        in_specs=[
            pl.BlockSpec((block_rows, lane_w), lambda i: (i, 0)),
            pl.BlockSpec((block_rows, lane_w), lambda i: (i, 0)),
        ],
        out_specs=pl.BlockSpec((block_rows, lane_w), lambda i: (i, 0)),
        compiler_params=pltpu.CompilerParams(
            dimension_semantics=("parallel",),   # shards grid across TCs (v7x)
            vmem_limit_bytes=32 * 1024 * 1024,   # safe on v5e/v6e/v7x
        ),
    )(x1f, x2f)

    if n_pad != n:
        result = out.reshape(-1)[:n].reshape(orig_shape)
    else:
        result = out.reshape(orig_shape)
    return result, kth_val_1, kth_val_2


if __name__ == "__main__":
    key = jax.random.PRNGKey(0)
    k1, k2, k3, k4 = jax.random.split(key, 4)

    # 1) Module-typical small NCHW activations (8 KiB): fast XLA fallback path.
    x1 = jax.random.normal(k1, (2, 4, 16, 16), dtype=jnp.float32)
    x2 = jax.random.normal(k2, (2, 4, 16, 16), dtype=jnp.float32)
    r_small, kth1, kth2 = efficient_memory_hadamard(x1, x2)
    jax.block_until_ready(r_small)
    assert jnp.allclose(r_small, x1 * x2, atol=1e-6, rtol=1e-6)
    assert r_small.shape == x1.shape and r_small.dtype == x1.dtype

    # 2) Same small shape forced through the Pallas path (kernel coverage).
    r_forced, _, _ = efficient_memory_hadamard(x1, x2, min_pallas_bytes=0)
    jax.block_until_ready(r_forced)
    assert jnp.allclose(r_forced, x1 * x2, atol=1e-6, rtol=1e-6)

    # 3) Larger f32 activation that takes the Pallas path by default.
    y1 = jax.random.normal(k3, (8, 8, 128, 128), dtype=jnp.float32)
    y2 = jax.random.normal(k4, (8, 8, 128, 128), dtype=jnp.float32)
    r_big, _, _ = efficient_memory_hadamard(y1, y2)
    jax.block_until_ready(r_big)
    assert jnp.allclose(r_big, y1 * y2, atol=1e-6, rtol=1e-6)

    # 4) bf16 path (halved HBM bytes; sublane multiple of 16).
    b1 = y1.astype(jnp.bfloat16)
    b2 = y2.astype(jnp.bfloat16)
    r_bf, _, _ = efficient_memory_hadamard(b1, b2)
    jax.block_until_ready(r_bf)
    assert jnp.allclose(
        r_bf.astype(jnp.float32), (b1 * b2).astype(jnp.float32),
        atol=1e-2, rtol=1e-2)

    # 5) Ragged (non-128-divisible) size through the kernel path.
    z1 = jax.random.normal(k1, (3, 7, 13, 11), dtype=jnp.float32)
    z2 = jax.random.normal(k2, (3, 7, 13, 11), dtype=jnp.float32)
    r_rag, _, _ = efficient_memory_hadamard(z1, z2, min_pallas_bytes=0)
    jax.block_until_ready(r_rag)
    assert jnp.allclose(r_rag, z1 * z2, atol=1e-6, rtol=1e-6)

    print("KERNEL_OK")
</pallas_src>

<mosaic_0001>
module attributes {stable_mosaic.version = 11 : i64} {
  func.func @_hadamard_kernel(%arg0: i32, %arg1: memref<8x2048xf32, #tpu.memory_space<vmem>>, %arg2: memref<8x2048xf32, #tpu.memory_space<vmem>>, %arg3: memref<8x2048xf32, #tpu.memory_space<vmem>>) attributes {dimension_semantics = [#tpu.dimension_semantics<parallel>], iteration_bounds = array<i64: 1>, scalar_prefetch = 0 : i64, scratch_operands = 0 : i64, tpu.core_type = #tpu.core_type<tc>, window_params = [{transform_indices = @transform_0, window_bounds = array<i64: 8, 2048>}, {transform_indices = @transform_1, window_bounds = array<i64: 8, 2048>}, {transform_indices = @transform_2, window_bounds = array<i64: 8, 2048>}]} {
    %c0 = arith.constant 0 : index
    %c0_0 = arith.constant 0 : index
    %0 = vector.load %arg1[%c0, %c0_0] : memref<8x2048xf32, #tpu.memory_space<vmem>>, vector<8x2048xf32>
    %c0_1 = arith.constant 0 : index
    %c0_2 = arith.constant 0 : index
    %1 = vector.load %arg2[%c0_1, %c0_2] : memref<8x2048xf32, #tpu.memory_space<vmem>>, vector<8x2048xf32>
    %2 = arith.mulf %0, %1 : vector<8x2048xf32>
    %c0_3 = arith.constant 0 : index
    %c0_4 = arith.constant 0 : index
    %3 = vector.load %arg3[%c0_3, %c0_4] : memref<8x2048xf32, #tpu.memory_space<vmem>>, vector<8x2048xf32>
    tpu.vector_store %arg3[%c0_3, %c0_4], %2 {strides = array<i32>} : memref<8x2048xf32, #tpu.memory_space<vmem>>, vector<8x2048xf32>,
    return
  }
  func.func @transform_0(%arg0: i32) -> (i32, i32) {
    %c0_i32 = arith.constant 0 : i32
    %c0_i32_0 = arith.constant 0 : i32
    return %arg0, %c0_i32 : i32, i32
  }
  func.func @transform_1(%arg0: i32) -> (i32, i32) {
    %c0_i32 = arith.constant 0 : i32
    %c0_i32_0 = arith.constant 0 : i32
    return %arg0, %c0_i32 : i32, i32
  }
  func.func @transform_2(%arg0: i32) -> (i32, i32) {
    %c0_i32 = arith.constant 0 : i32
    %c0_i32_0 = arith.constant 0 : i32
    return %arg0, %c0_i32 : i32, i32
  }
}

</mosaic_0001>

<bundles_post_ra>
// kernel: tpu_custom_call.1
= control target key start
LH: loop header
LB: loop body
LE: loop exit
PB: predicated region body
PF: predicated region fallthrough
CT: control target
= control target key end

     0   :  { %7 = vsyncpa [#allocation3], 0  ;;  %s231_s0 = inlined_call_operand.hbm [shape: f32[1,2048], index: 0, kind: input, shape index: {}]   ;;  %s232_s1 = inlined_call_operand.hbm [shape: f32[1,2048], index: 1, kind: input, shape index: {}]   ;;  %s233_s2 = inlined_call_operand.hbm [shape: f32[1,2048], index: 2, kind: output, shape index: {}]  }
   0x1   :  { %8 = vsyncpa [#allocation6], 0 }
   0x2   :  { %9 = vsyncpa [#allocation4], 0 }
   0x3   :  { %14 = vsyncadd [#allocation3], 1792  ;;  %s193_s9 = smov [#allocation2]  }
   0x4   :  { %s15_s10 = sshll.u32 %s193_s9, 4  ;;  %s16_s10 = int_to_ptr.vmem [resolvable:$true] %s15_s10 }
   0x5   :  { %s135_s11 = scalar_lea.vmem %s16_s10, 256  ;;  %s139_s12 = scalar_lea.vmem %s16_s10, 2048 }
   0x6   :  { %p136_p0 = scmp.ne.s32.totalorder %s16_s10, %s135_s11  ;;  %p140_p1 = scmp.lt.s32.totalorder %s16_s10, %s16_s10 }
   0x7   :  { %p141_p2 = scmp.lt.s32.totalorder %s139_s12, %s135_s11 }
   0x9   :  { %p142_p3 = por %p141_p2, %p140_p1 }
   0xb   :  { %p143_p4 = pnand %p142_p3, %p136_p0 }
   0xd   :  { %146 = shalt.err (!%p143_p4)
}
   0xe   :  { %s194_s13 = smov 256   ;;  %s195_s14 = smov 16  }
   0xf   :  { %21 = dma.hbm_to_vmem [thread:$0]  %s231_s0, 256, %s16_s10, [#allocation3], %s194_s13, %s194_s13, %s195_s14  }
  0x10   :  { %26 = vsyncadd [#allocation6], 1792  ;;  %s196_s17 = smov [#allocation5]  }
  0x11   :  { %s27_s18 = sshll.u32 %s196_s17, 4  ;;  %s28_s18 = int_to_ptr.vmem [resolvable:$true] %s27_s18 }
  0x12   :  { %s155_s19 = scalar_lea.vmem %s28_s18, 256  ;;  %s159_s20 = scalar_lea.vmem %s28_s18, 2048 }
  0x13   :  { %p156_p5 = scmp.ne.s32.totalorder %s28_s18, %s155_s19  ;;  %p160_p6 = scmp.lt.s32.totalorder %s28_s18, %s28_s18 }
  0x14   :  { %p161_p7 = scmp.lt.s32.totalorder %s159_s20, %s155_s19 }
  0x16   :  { %p162_p8 = por %p161_p7, %p160_p6 }
  0x18   :  { %p163_p9 = pnand %p162_p8, %p156_p5 }
  0x1a   :  { %166 = shalt.err (!%p163_p9)
}
  0x1b   :  { %33 = dma.hbm_to_vmem [thread:$0]  %s232_s1, 256, %s28_s18, [#allocation6], %s194_s13, %s194_s13, %s195_s14  }
  0x1c   :  { %187 = dma.done.wait [#allocation3], 2048  }
  0x1d   :  { %188 = vsyncadd [#allocation3], 4294965248 }
  0x1e   :  { %189 = dma.done.wait [#allocation6], 2048  }
  0x1f   :  { %190 = vsyncadd [#allocation6], 4294965248  ;;  %v40_v0 = vld [vmem:[#allocation2] sm:$0xff]  ;;  %v41_v2 = vld [vmem:[#allocation2 + $0x8] sm:$0xff] }
  0x20   :  { %v56_v1 = vld [vmem:[#allocation5] sm:$0xff]  ;;  %v57_v4 = vld [vmem:[#allocation5 + $0x8] sm:$0xff]  ;;  %v42_v5 = vld [vmem:[#allocation2 + $0x10] sm:$0xff] }
  0x21   :  { %v72_v3 = vmul.f32 %v56_v1, %v40_v0  ;;  %v58_v6 = vld [vmem:[#allocation5 + $0x10] sm:$0xff]  ;;  %v73_v7 = vmul.f32 %v57_v4, %v41_v2  ;;  %v43_v9 = vld [vmem:[#allocation2 + $0x18] sm:$0xff]  ;;  %v44_v11 = vld [vmem:[#allocation2 + $0x20] sm:$0xff] }
  0x22   :  { %v74_v8 = vmul.f32 %v58_v6, %v42_v5  ;;  %v59_v10 = vld [vmem:[#allocation5 + $0x18] sm:$0xff]  ;;  %v60_v13 = vld [vmem:[#allocation5 + $0x20] sm:$0xff]  ;;  %v45_v14 = vld [vmem:[#allocation2 + $0x28] sm:$0xff] }
  0x23   :  { %88 = vst [vmem:[#allocation7] sm:$0xff] %v72_v3  ;;  %v75_v12 = vmul.f32 %v59_v10, %v43_v9  ;;  %v61_v15 = vld [vmem:[#allocation5 + $0x28] sm:$0xff]  ;;  %89 = vst [vmem:[#allocation7 + $0x8] sm:$0xff] %v73_v7  ;;  %v76_v16 = vmul.f32 %v60_v13, %v44_v11  ;;  %v46_v18 = vld [vmem:[#allocation2 + $0x30] sm:$0xff] }
  0x24   :  { %90 = vst [vmem:[#allocation7 + $0x10] sm:$0xff] %v74_v8  ;;  %v77_v17 = vmul.f32 %v61_v15, %v45_v14  ;;  %v62_v19 = vld [vmem:[#allocation5 + $0x30] sm:$0xff]  ;;  %v47_v20 = vld [vmem:[#allocation2 + $0x38] sm:$0xff]  ;;  %v48_v23 = vld [vmem:[#allocation2 + $0x40] sm:$0xff] }
  0x25   :  { %91 = vst [vmem:[#allocation7 + $0x18] sm:$0xff] %v75_v12  ;;  %v78_v21 = vmul.f32 %v62_v19, %v46_v18  ;;  %v63_v22 = vld [vmem:[#allocation5 + $0x38] sm:$0xff]  ;;  %v64_v24 = vld [vmem:[#allocation5 + $0x40] sm:$0xff]  ;;  %92 = vst [vmem:[#allocation7 + $0x20] sm:$0xff] %v76_v16 }
  0x26   :  { %93 = vst [vmem:[#allocation7 + $0x28] sm:$0xff] %v77_v17  ;;  %v79_v25 = vmul.f32 %v63_v22, %v47_v20  ;;  %v80_v26 = vmul.f32 %v64_v24, %v48_v23  ;;  %v49_v27 = vld [vmem:[#allocation2 + $0x48] sm:$0xff]  ;;  %v50_v29 = vld [vmem:[#allocation2 + $0x50] sm:$0xff]  ;;  %v51_v32 = vld [vmem:[#allocation2 + $0x58] sm:$0xff] }
  0x27   :  { %v65_v28 = vld [vmem:[#allocation5 + $0x48] sm:$0xff]  ;;  %94 = vst [vmem:[#allocation7 + $0x30] sm:$0xff] %v78_v21  ;;  %v66_v31 = vld [vmem:[#allocation5 + $0x50] sm:$0xff]  ;;  %v67_v33 = vld [vmem:[#allocation5 + $0x58] sm:$0xff] }
  0x28   :  { %v81_v30 = vmul.f32 %v65_v28, %v49_v27  ;;  %95 = vst [vmem:[#allocation7 + $0x38] sm:$0xff] %v79_v25  ;;  %96 = vst [vmem:[#allocation7 + $0x40] sm:$0xff] %v80_v26  ;;  %v82_v34 = vmul.f32 %v66_v31, %v50_v29  ;;  %v83_v35 = vmul.f32 %v67_v33, %v51_v32  ;;  %v52_v36 = vld [vmem:[#allocation2 + $0x60] sm:$0xff]  ;;  %v53_v38 = vld [vmem:[#allocation2 + $0x68] sm:$0xff] }
  0x29   :  { %v68_v37 = vld [vmem:[#allocation5 + $0x60] sm:$0xff]  ;;  %v69_v40 = vld [vmem:[#allocation5 + $0x68] sm:$0xff]  ;;  %v54_v41 = vld [vmem:[#allocation2 + $0x70] sm:$0xff] }
  0x2a   :  { %97 = vst [vmem:[#allocation7 + $0x48] sm:$0xff] %v81_v30  ;;  %v84_v39 = vmul.f32 %v68_v37, %v52_v36  ;;  %v70_v42 = vld [vmem:[#allocation5 + $0x70] sm:$0xff]  ;;  %98 = vst [vmem:[#allocation7 + $0x50] sm:$0xff] %v82_v34  ;;  %v85_v43 = vmul.f32 %v69_v40, %v53_v38  ;;  %v55_v45 = vld [vmem:[#allocation2 + $0x78] sm:$0xff] }
  0x2b   :  { %99 = vst [vmem:[#allocation7 + $0x58] sm:$0xff] %v83_v35  ;;  %v86_v44 = vmul.f32 %v70_v42, %v54_v41  ;;  %v71_v46 = vld [vmem:[#allocation5 + $0x78] sm:$0xff] }
  0x2c   :  { %100 = vst [vmem:[#allocation7 + $0x60] sm:$0xff] %v84_v39  ;;  %v87_v47 = vmul.f32 %v71_v46, %v55_v45  ;;  %101 = vst [vmem:[#allocation7 + $0x68] sm:$0xff] %v85_v43 }
  0x2d   :  { %102 = vst [vmem:[#allocation7 + $0x70] sm:$0xff] %v86_v44 }
  0x2e   :  { %103 = vst [vmem:[#allocation7 + $0x78] sm:$0xff] %v87_v47 }
  0x2f   :  { %108 = vsyncadd [#allocation4], 1792  ;;  %s197_s0 = smov [#allocation7]  }
  0x30   :  { %s109_s1 = sshll.u32 %s197_s0, 4  ;;  %s110_s1 = int_to_ptr.vmem [resolvable:$true] %s109_s1 }
  0x31   :  { %s167_s23 = scalar_lea.vmem %s110_s1, 256  ;;  %s171_s24 = scalar_lea.vmem %s110_s1, 2048 }
  0x32   :  { %p168_p10 = scmp.ne.s32.totalorder %s110_s1, %s167_s23  ;;  %p172_p11 = scmp.lt.s32.totalorder %s110_s1, %s110_s1 }
  0x33   :  { %p173_p12 = scmp.lt.s32.totalorder %s171_s24, %s167_s23 }
  0x35   :  { %p174_p13 = por %p173_p12, %p172_p11 }
  0x37   :  { %p175_p0 = pnand %p174_p13, %p168_p10 }
  0x39   :  { %178 = shalt.err (!%p175_p0)
}
  0x3a   :  { %115 = dma.vmem_to_hbm [thread:$0]  %s110_s1, 256, %s233_s2, [#allocation4], %s194_s13, %s194_s13, %s195_s14  }
  0x3b   :  { %191 = dma.done.wait [#allocation4], 2048  }
  0x3c   :  { %192 = vsyncadd [#allocation4], 4294965248 }
  0x3d   :  { %119 = vsyncpa [#allocation3], 1 }
  0x3e   :  { %120 = vsyncpa [#allocation6], 1 }
  0x3f   :  { %121 = vsyncpa [#allocation4], 1 }

</bundles_post_ra>
